<compile_context>
chip_gen: v6e
topology: v6e:2x2x1
jax: 0.10.0
libtpu: 0.0.40
codegen_flags: <defaults>
</compile_context>

<pallas_src>
import functools

import jax
import jax.numpy as jnp
from jax.experimental import pallas as pl
from jax.experimental.pallas import tpu as pltpu

LEAKY_SLOPE = 0.01  # nn.LeakyReLU() default negative_slope


def _leaky_relu(x):
    return jnp.where(x > 0, x, LEAKY_SLOPE * x)


def mlp_kernel(x_ref, w1_ref, b1_ref, w2_ref, b2_ref, o_ref):
    # Layer 0: Linear -> LeakyReLU -> (dropout == identity at inference).
    x = x_ref[...]
    h = jnp.dot(x, w1_ref[...].astype(jnp.float32),
                preferred_element_type=jnp.float32)
    h = _leaky_relu(h + b1_ref[...])          # b1 is (1, dp1), broadcasts over rows
    # Layer 1 (last): Linear -> LeakyReLU (keep_last_layer=False).
    # Keep activations in f32; upcast the weight rather than downcast h.
    y = jnp.dot(h, w2_ref[...].astype(jnp.float32),
                preferred_element_type=jnp.float32)
    o_ref[...] = _leaky_relu(y + b2_ref[...]).astype(o_ref.dtype)


def _round_up(v, m):
    return ((v + m - 1) // m) * m


@functools.partial(jax.jit, static_argnames=("block_n", "pack"))
def mlp_forward(x, w1, b1, w2, b2, *, block_n=1024, pack=8):
    """Fused 2-layer MLP forward.

    block_n: row tile in ORIGINAL rows (multiple of 8*pack recommended).
    pack:    rows lane-packed per packed row (8 for v6e/v7x 256-wide MXU,
             4 for v5e's 128-wide MXU).
    """
    n, d0 = x.shape
    d1 = w1.shape[1]
    d2 = w2.shape[1]
    assert w1.shape == (d0, d1) and w2.shape == (d1, d2)
    p = max(1, int(pack))
    f32 = jnp.float32

    # ---- Lane-pack p consecutive rows into one packed row ------------------
    n_pad = _round_up(n, p)
    if n_pad != n:
        x = jnp.pad(x, ((0, n_pad - n), (0, 0)))     # zero rows, sliced off below
    np_rows = n_pad // p
    xp = x.reshape(np_rows, p * d0)                   # row-major: rows concatenated

    # Block-diagonal weights: block (i,i) = W, so packed math == per-row math.
    eye = jnp.eye(p, dtype=f32)
    w1_bd = jnp.kron(eye, w1.astype(f32))             # (p*d0, p*d1)
    w2_bd = jnp.kron(eye, w2.astype(f32))             # (p*d1, p*d2)
    b1_t = jnp.tile(b1.astype(f32).reshape(1, d1), (1, p))   # (1, p*d1)
    b2_t = jnp.tile(b2.astype(f32).reshape(1, d2), (1, p))   # (1, p*d2)

    dp0, dp1, dp2 = p * d0, p * d1, p * d2

    # ---- Row tiling over packed rows ---------------------------------------
    bnp = max(8, min(block_n // p, _round_up(np_rows, 8)))
    bnp = _round_up(bnp, 8)
    # Keep >= 2 grid steps when there is enough work: negligible extra
    # per-step overhead on single-TC chips, but lets dimension_semantics=
    # ("parallel",) use both TensorCores on v7x.
    if np_rows >= 16 and bnp >= np_rows:
        bnp = _round_up(pl.cdiv(np_rows, 2), 8)
    grid = (pl.cdiv(np_rows, bnp),)

    itemsize = jnp.dtype(f32).itemsize
    cost = pl.CostEstimate(
        flops=2 * np_rows * (dp0 * dp1 + dp1 * dp2),
        transcendentals=0,
        bytes_accessed=itemsize * (np_rows * (dp0 + dp2)
                                   + dp0 * dp1 + dp1 * dp2 + dp1 + dp2),
    )

    out_packed = pl.pallas_call(
        mlp_kernel,
        out_shape=jax.ShapeDtypeStruct((np_rows, dp2), f32),
        grid_spec=pltpu.PrefetchScalarGridSpec(
            num_scalar_prefetch=0,
            grid=grid,
            in_specs=[
                pl.BlockSpec((bnp, dp0), lambda i: (i, 0)),   # packed x row tile
                pl.BlockSpec((dp0, dp1), lambda i: (0, 0)),   # W1 block-diag (VMEM-resident)
                pl.BlockSpec((1, dp1), lambda i: (0, 0)),     # b1 tiled
                pl.BlockSpec((dp1, dp2), lambda i: (0, 0)),   # W2 block-diag (VMEM-resident)
                pl.BlockSpec((1, dp2), lambda i: (0, 0)),     # b2 tiled
            ],
            out_specs=pl.BlockSpec((bnp, dp2), lambda i: (i, 0)),
        ),
        compiler_params=pltpu.CompilerParams(
            dimension_semantics=("parallel",)),
        cost_estimate=cost,
    )(xp, w1_bd, b1_t, w2_bd, b2_t)

    out = out_packed.reshape(n_pad, d2)               # un-pack rows (pure view)
    if n_pad != n:
        out = out[:n]
    return out.astype(x.dtype)


def reference_mlp(x, w1, b1, w2, b2):
    h = _leaky_relu(x @ w1 + b1.reshape(1, -1))       # dropout = identity (inference)
    return _leaky_relu(h @ w2 + b2.reshape(1, -1))


if __name__ == "__main__":
    # MLP(dims=[32, 64, 32], layers=2).
    D0, D1, D2 = 32, 64, 32
    key = jax.random.PRNGKey(0)
    kx, kw1, kb1, kw2, kb2, kx2 = jax.random.split(key, 6)

    # Deterministic init mimicking nn.Linear's uniform(-1/sqrt(fan_in), ...).
    lim1 = 1.0 / jnp.sqrt(D0)
    lim2 = 1.0 / jnp.sqrt(D1)
    w1 = jax.random.uniform(kw1, (D0, D1), jnp.float32, -lim1, lim1)
    b1 = jax.random.uniform(kb1, (D1,), jnp.float32, -lim1, lim1)
    w2 = jax.random.uniform(kw2, (D1, D2), jnp.float32, -lim2, lim2)
    b2 = jax.random.uniform(kb2, (D2,), jnp.float32, -lim2, lim2)

    # Case 1: batch divisible by pack*8 -> grid of 2 (both v7x TCs usable).
    N1 = 512
    x1 = jax.random.normal(kx, (N1, D0), dtype=jnp.float32)
    out1 = jax.block_until_ready(mlp_forward(x1, w1, b1, w2, b2))
    ref1 = reference_mlp(x1, w1, b1, w2, b2)
    assert out1.shape == (N1, D2)
    assert jnp.allclose(out1, ref1, atol=1e-5, rtol=1e-5)

    # Case 2: ragged batch (not a multiple of pack, partial last row tile).
    N2 = 203
    x2 = jax.random.normal(kx2, (N2, D0), dtype=jnp.float32)
    out2 = jax.block_until_ready(mlp_forward(x2, w1, b1, w2, b2, block_n=512))
    ref2 = reference_mlp(x2, w1, b1, w2, b2)
    assert out2.shape == (N2, D2)
    assert jnp.allclose(out2, ref2, atol=1e-5, rtol=1e-5)

    print("KERNEL_OK")
</pallas_src>

<mosaic_0001>
module attributes {stable_mosaic.version = 11 : i64} {
  func.func @mlp_kernel(%arg0: i32, %arg1: memref<32x256xf32, #tpu.memory_space<vmem>>, %arg2: memref<256x512xf32, #tpu.memory_space<vmem>>, %arg3: memref<1x512xf32, #tpu.memory_space<vmem>>, %arg4: memref<512x256xf32, #tpu.memory_space<vmem>>, %arg5: memref<1x256xf32, #tpu.memory_space<vmem>>, %arg6: memref<32x256xf32, #tpu.memory_space<vmem>>) attributes {dimension_semantics = [#tpu.dimension_semantics<parallel>], iteration_bounds = array<i64: 2>, scalar_prefetch = 0 : i64, scratch_operands = 0 : i64, tpu.core_type = #tpu.core_type<tc>, window_params = [{transform_indices = @transform_0, window_bounds = array<i64: 32, 256>}, {pipeline_mode = #tpu.pipeline_mode<synchronous>, transform_indices = @transform_1, window_bounds = array<i64: 256, 512>}, {pipeline_mode = #tpu.pipeline_mode<synchronous>, transform_indices = @transform_2, window_bounds = array<i64: 1, 512>}, {pipeline_mode = #tpu.pipeline_mode<synchronous>, transform_indices = @transform_3, window_bounds = array<i64: 512, 256>}, {pipeline_mode = #tpu.pipeline_mode<synchronous>, transform_indices = @transform_4, window_bounds = array<i64: 1, 256>}, {transform_indices = @transform_5, window_bounds = array<i64: 32, 256>}]} {
    %c0 = arith.constant 0 : index
    %c0_0 = arith.constant 0 : index
    %0 = vector.load %arg1[%c0, %c0_0] : memref<32x256xf32, #tpu.memory_space<vmem>>, vector<32x256xf32>
    %c0_1 = arith.constant 0 : index
    %c0_2 = arith.constant 0 : index
    %1 = vector.load %arg2[%c0_1, %c0_2] : memref<256x512xf32, #tpu.memory_space<vmem>>, vector<256x512xf32>
    %cst = arith.constant dense<0.000000e+00> : vector<32x512xf32>
    %2 = tpu.matmul %0, %1, %cst {dimension_numbers = #tpu.dot_dimension_numbers<[1], [0], [0], [1], [0, 0, 1, 1], [], []>} : vector<32x256xf32>, vector<256x512xf32>, vector<32x512xf32> -> vector<32x512xf32>
    %c0_3 = arith.constant 0 : index
    %c0_4 = arith.constant 0 : index
    %3 = vector.load %arg3[%c0_3, %c0_4] : memref<1x512xf32, #tpu.memory_space<vmem>>, vector<1x512xf32>
    %4 = vector.broadcast %3 : vector<1x512xf32> to vector<32x512xf32>
    %5 = arith.addf %2, %4 : vector<32x512xf32>
    %cst_5 = arith.constant 0.000000e+00 : f32
    %6 = vector.broadcast %cst_5 : f32 to vector<32x512xf32>
    %7 = arith.cmpf ogt, %5, %6 : vector<32x512xf32>
    %cst_6 = arith.constant 0.00999999977 : f32
    %8 = vector.broadcast %cst_6 : f32 to vector<32x512xf32>
    %9 = arith.mulf %8, %5 : vector<32x512xf32>
    %10 = arith.select %7, %5, %9 : vector<32x512xi1>, vector<32x512xf32>
    %c0_7 = arith.constant 0 : index
    %c0_8 = arith.constant 0 : index
    %11 = vector.load %arg4[%c0_7, %c0_8] : memref<512x256xf32, #tpu.memory_space<vmem>>, vector<512x256xf32>
    %cst_9 = arith.constant dense<0.000000e+00> : vector<32x256xf32>
    %12 = tpu.matmul %10, %11, %cst_9 {dimension_numbers = #tpu.dot_dimension_numbers<[1], [0], [0], [1], [0, 0, 1, 1], [], []>} : vector<32x512xf32>, vector<512x256xf32>, vector<32x256xf32> -> vector<32x256xf32>
    %c0_10 = arith.constant 0 : index
    %c0_11 = arith.constant 0 : index
    %13 = vector.load %arg5[%c0_10, %c0_11] : memref<1x256xf32, #tpu.memory_space<vmem>>, vector<1x256xf32>
    %14 = vector.broadcast %13 : vector<1x256xf32> to vector<32x256xf32>
    %15 = arith.addf %12, %14 : vector<32x256xf32>
    %cst_12 = arith.constant 0.000000e+00 : f32
    %16 = vector.broadcast %cst_12 : f32 to vector<32x256xf32>
    %17 = arith.cmpf ogt, %15, %16 : vector<32x256xf32>
    %cst_13 = arith.constant 0.00999999977 : f32
    %18 = vector.broadcast %cst_13 : f32 to vector<32x256xf32>
    %19 = arith.mulf %18, %15 : vector<32x256xf32>
    %20 = arith.select %17, %15, %19 : vector<32x256xi1>, vector<32x256xf32>
    %c0_14 = arith.constant 0 : index
    %c0_15 = arith.constant 0 : index
    %21 = vector.load %arg6[%c0_14, %c0_15] : memref<32x256xf32, #tpu.memory_space<vmem>>, vector<32x256xf32>
    tpu.vector_store %arg6[%c0_14, %c0_15], %20 {strides = array<i32>} : memref<32x256xf32, #tpu.memory_space<vmem>>, vector<32x256xf32>,
    return
  }
  func.func @transform_0(%arg0: i32) -> (i32, i32) {
    %c0_i32 = arith.constant 0 : i32
    %c0_i32_0 = arith.constant 0 : i32
    return %arg0, %c0_i32 : i32, i32
  }
  func.func @transform_1(%arg0: i32) -> (i32, i32) {
    %c0_i32 = arith.constant 0 : i32
    %c0_i32_0 = arith.constant 0 : i32
    %c0_i32_1 = arith.constant 0 : i32
    return %c0_i32, %c0_i32_0 : i32, i32
  }
  func.func @transform_2(%arg0: i32) -> (i32, i32) {
    %c0_i32 = arith.constant 0 : i32
    %c0_i32_0 = arith.constant 0 : i32
    %c0_i32_1 = arith.constant 0 : i32
    return %c0_i32, %c0_i32_0 : i32, i32
  }
  func.func @transform_3(%arg0: i32) -> (i32, i32) {
    %c0_i32 = arith.constant 0 : i32
    %c0_i32_0 = arith.constant 0 : i32
    %c0_i32_1 = arith.constant 0 : i32
    return %c0_i32, %c0_i32_0 : i32, i32
  }
  func.func @transform_4(%arg0: i32) -> (i32, i32) {
    %c0_i32 = arith.constant 0 : i32
    %c0_i32_0 = arith.constant 0 : i32
    %c0_i32_1 = arith.constant 0 : i32
    return %c0_i32, %c0_i32_0 : i32, i32
  }
  func.func @transform_5(%arg0: i32) -> (i32, i32) {
    %c0_i32 = arith.constant 0 : i32
    %c0_i32_0 = arith.constant 0 : i32
    return %arg0, %c0_i32 : i32, i32
  }
}

</mosaic_0001>

<bundles_post_ra>
// kernel: mlp_forward.1
= control target key start
LH: loop header
LB: loop body
LE: loop exit
PB: predicated region body
PF: predicated region fallthrough
CT: control target
= control target key end

     0   :  { %s1086_s18 = smov 0   ;;  %s1952_s0 = inlined_call_operand.vmem [shape: f32[64,256], index: 0, kind: input, shape index: {}]   ;;  %s1953_s1 = inlined_call_operand.vmem [shape: f32[256,512], index: 1, kind: input, shape index: {}]   ;;  %s1954_s2 = inlined_call_operand.vmem [shape: f32[1,512], index: 2, kind: input, shape index: {}]   ;;  %s1955_s3 = inlined_call_operand.vmem [shape: f32[512,256], index: 3, kind: input, shape index: {}]   ;;  %s1956_s4 = inlined_call_operand.vmem [shape: f32[1,256], index: 4, kind: input, shape index: {}]   ;;  %s1957_s5 = inlined_call_operand.vmem [shape: f32[64,256], index: 5, kind: output, shape index: {}]  }
   0x1 LB: > { %s1025_s19 = sadd.s32 4294967295, %s1054_s18   ;;  %p1029_p0 = scmp.ge.s32.totalorder %s1054_s18, 1  ;;  %s1054_s18 = sphi %s1086_s18, %s15_s18  }
   0x2   : > { %p189_p1 = scmp.lt.s32.totalorder %s1054_s18, 3 }
   0x4   : > { %p190_p2 = pnand %p1029_p0, %p189_p1 }
   0x5   : > { %s1378_s24 = sshll.u32 (!%p190_p2), %s1025_s19, 2 }
   0x6   : > { %193 = sbr.rel (%p190_p2) target bundleno = 495 (0x1ef), region = 40  ;;  %p220_p3 = scmp.lt.s32.totalorder (!%p190_p2), %s1378_s24, 7 }
   0xb   : > { %v302_v0 = vld [vmem:[%s1953_s1 + $0x1e8] sm:$0xff]  ;;  %v304_v1 = vld [vmem:[%s1953_s1 + $0x1f8] sm:$0xff]  ;;  %v301_v2 = vld [vmem:[%s1953_s1 + $0x1e0] sm:$0xff]  ;;  %s1959_s24 = smov (!%p220_p3, %s1378_s24), 7 }
   0xc   : > { %391 = vmatprep.subr.mxu0 %v302_v0  ;;  %480 = vmatprep.subr.mxu1 %v304_v1  ;;  %v303_v3 = vld [vmem:[%s1953_s1 + $0x1f0] sm:$0xff]  ;;  %v298_v4 = vld [vmem:[%s1953_s1 + $0x1c8] sm:$0xff]  ;;  %v300_v5 = vld [vmem:[%s1953_s1 + $0x1d8] sm:$0xff]  ;;  %s1038_s22 = sshll.u32 %s1959_s24, 4 }
   0xd   : > { %392 = vmatpush1.msra.mxu0 %v301_v2  ;;  %481 = vmatpush1.msra.mxu1 %v303_v3  ;;  %v297_v6 = vld [vmem:[%s1953_s1 + $0x1c0] sm:$0xff]  ;;  %v299_v7 = vld [vmem:[%s1953_s1 + $0x1d0] sm:$0xff]  ;;  %v294_v8 = vld [vmem:[%s1953_s1 + $0x1a8] sm:$0xff]  ;;  %s1476_s12 = scalar_lea.vmem %s1952_s0, %s1038_s22  ;;  %s1939_s28 = scalar_lea.vmem %s1957_s5, %s1038_s22 }
   0xe   : > { %393 = vmatprep.subr.mxu0 %v298_v4  ;;  %482 = vmatprep.subr.mxu1 %v300_v5  ;;  %v296_v9 = vld [vmem:[%s1953_s1 + $0x1b8] sm:$0xff]  ;;  %v293_v10 = vld [vmem:[%s1953_s1 + $0x1a0] sm:$0xff]  ;;  %v295_v11 = vld [vmem:[%s1953_s1 + $0x1b0] sm:$0xff] }
   0xf   : > { %394 = vmatpush1.msra.mxu0 %v297_v6  ;;  %483 = vmatpush1.msra.mxu1 %v299_v7  ;;  %v290_v12 = vld [vmem:[%s1953_s1 + $0x188] sm:$0xff]  ;;  %v292_v13 = vld [vmem:[%s1953_s1 + $0x198] sm:$0xff]  ;;  %v289_v14 = vld [vmem:[%s1953_s1 + $0x180] sm:$0xff] }
  0x10   : > { %395 = vmatprep.subr.mxu0 %v294_v8  ;;  %484 = vmatprep.subr.mxu1 %v296_v9  ;;  %v291_v15 = vld [vmem:[%s1953_s1 + $0x190] sm:$0xff]  ;;  %v286_v16 = vld [vmem:[%s1953_s1 + $0x168] sm:$0xff]  ;;  %v288_v17 = vld [vmem:[%s1953_s1 + $0x178] sm:$0xff] }
  0x11   : > { %396 = vmatpush1.msra.mxu0 %v293_v10  ;;  %485 = vmatpush1.msra.mxu1 %v295_v11  ;;  %v285_v18 = vld [vmem:[%s1953_s1 + $0x160] sm:$0xff]  ;;  %v287_v19 = vld [vmem:[%s1953_s1 + $0x170] sm:$0xff]  ;;  %v282_v20 = vld [vmem:[%s1953_s1 + $0x148] sm:$0xff] }
  0x12   : > { %397 = vmatprep.subr.mxu0 %v290_v12  ;;  %486 = vmatprep.subr.mxu1 %v292_v13  ;;  %v284_v21 = vld [vmem:[%s1953_s1 + $0x158] sm:$0xff]  ;;  %v281_v22 = vld [vmem:[%s1953_s1 + $0x140] sm:$0xff]  ;;  %v283_v23 = vld [vmem:[%s1953_s1 + $0x150] sm:$0xff] }
  0x13   : > { %398 = vmatpush1.msra.mxu0 %v289_v14  ;;  %487 = vmatpush1.msra.mxu1 %v291_v15  ;;  %v278_v24 = vld [vmem:[%s1953_s1 + $0x128] sm:$0xff]  ;;  %v280_v25 = vld [vmem:[%s1953_s1 + $0x138] sm:$0xff]  ;;  %v277_v26 = vld [vmem:[%s1953_s1 + $0x120] sm:$0xff] }
  0x14   : > { %399 = vmatprep.subr.mxu0 %v286_v16  ;;  %488 = vmatprep.subr.mxu1 %v288_v17  ;;  %v279_v27 = vld [vmem:[%s1953_s1 + $0x130] sm:$0xff]  ;;  %v274_v28 = vld [vmem:[%s1953_s1 + $0x108] sm:$0xff]  ;;  %v276_v29 = vld [vmem:[%s1953_s1 + $0x118] sm:$0xff] }
  0x15   : > { %400 = vmatpush1.msra.mxu0 %v285_v18  ;;  %489 = vmatpush1.msra.mxu1 %v287_v19  ;;  %v273_v30 = vld [vmem:[%s1953_s1 + $0x100] sm:$0xff]  ;;  %v275_v31 = vld [vmem:[%s1953_s1 + $0x110] sm:$0xff]  ;;  %v270_v32 = vld [vmem:[%s1953_s1 + $0xe8] sm:$0xff] }
  0x16   : > { %401 = vmatprep.subr.mxu0 %v282_v20  ;;  %490 = vmatprep.subr.mxu1 %v284_v21  ;;  %v272_v33 = vld [vmem:[%s1953_s1 + $0xf8] sm:$0xff]  ;;  %v269_v34 = vld [vmem:[%s1953_s1 + $0xe0] sm:$0xff]  ;;  %v271_v35 = vld [vmem:[%s1953_s1 + $0xf0] sm:$0xff] }
  0x17   : > { %402 = vmatpush1.msra.mxu0 %v281_v22  ;;  %491 = vmatpush1.msra.mxu1 %v283_v23  ;;  %v266_v36 = vld [vmem:[%s1953_s1 + $0xc8] sm:$0xff]  ;;  %v268_v37 = vld [vmem:[%s1953_s1 + $0xd8] sm:$0xff]  ;;  %v265_v38 = vld [vmem:[%s1953_s1 + $0xc0] sm:$0xff] }
  0x18   : > { %403 = vmatprep.subr.mxu0 %v278_v24  ;;  %492 = vmatprep.subr.mxu1 %v280_v25  ;;  %v267_v39 = vld [vmem:[%s1953_s1 + $0xd0] sm:$0xff]  ;;  %v262_v40 = vld [vmem:[%s1953_s1 + $0xa8] sm:$0xff]  ;;  %v264_v41 = vld [vmem:[%s1953_s1 + $0xb8] sm:$0xff] }
  0x19   : > { %404 = vmatpush1.msra.mxu0 %v277_v26  ;;  %493 = vmatpush1.msra.mxu1 %v279_v27  ;;  %v261_v42 = vld [vmem:[%s1953_s1 + $0xa0] sm:$0xff]  ;;  %v263_v43 = vld [vmem:[%s1953_s1 + $0xb0] sm:$0xff]  ;;  %v258_v44 = vld [vmem:[%s1953_s1 + $0x88] sm:$0xff] }
  0x1a   : > { %405 = vmatprep.subr.mxu0 %v274_v28  ;;  %494 = vmatprep.subr.mxu1 %v276_v29  ;;  %v260_v45 = vld [vmem:[%s1953_s1 + $0x98] sm:$0xff]  ;;  %v257_v46 = vld [vmem:[%s1953_s1 + $0x80] sm:$0xff]  ;;  %v259_v47 = vld [vmem:[%s1953_s1 + $0x90] sm:$0xff] }
  0x1b   : > { %406 = vmatpush1.msra.mxu0 %v273_v30  ;;  %495 = vmatpush1.msra.mxu1 %v275_v31  ;;  %v254_v48 = vld [vmem:[%s1953_s1 + $0x68] sm:$0xff]  ;;  %v256_v49 = vld [vmem:[%s1953_s1 + $0x78] sm:$0xff]  ;;  %v253_v50 = vld [vmem:[%s1953_s1 + $0x60] sm:$0xff] }
  0x1c   : > { %407 = vmatprep.subr.mxu0 %v270_v32  ;;  %496 = vmatprep.subr.mxu1 %v272_v33  ;;  %v255_v51 = vld [vmem:[%s1953_s1 + $0x70] sm:$0xff]  ;;  %v250_v52 = vld [vmem:[%s1953_s1 + $0x48] sm:$0xff]  ;;  %v252_v53 = vld [vmem:[%s1953_s1 + $0x58] sm:$0xff] }
  0x1d   : > { %408 = vmatpush1.msra.mxu0 %v269_v34  ;;  %497 = vmatpush1.msra.mxu1 %v271_v35  ;;  %v249_v54 = vld [vmem:[%s1953_s1 + $0x40] sm:$0xff]  ;;  %v251_v55 = vld [vmem:[%s1953_s1 + $0x50] sm:$0xff]  ;;  %v246_v56 = vld [vmem:[%s1953_s1 + $0x28] sm:$0xff] }
  0x1e   : > { %409 = vmatprep.subr.mxu0 %v266_v36  ;;  %498 = vmatprep.subr.mxu1 %v268_v37  ;;  %v248_v57 = vld [vmem:[%s1953_s1 + $0x38] sm:$0xff]  ;;  %v245_v58 = vld [vmem:[%s1953_s1 + $0x20] sm:$0xff]  ;;  %v247_v59 = vld [vmem:[%s1953_s1 + $0x30] sm:$0xff] }
  0x1f   : > { %410 = vmatpush1.msra.mxu0 %v265_v38  ;;  %499 = vmatpush1.msra.mxu1 %v267_v39  ;;  %v242_v60 = vld [vmem:[%s1953_s1 + $0x8] sm:$0xff]  ;;  %v244_v61 = vld [vmem:[%s1953_s1 + $0x18] sm:$0xff]  ;;  %v241_v62 = vld [vmem:[%s1953_s1] sm:$0xff] }
  0x20   : > { %411 = vmatprep.subr.mxu0 %v262_v40  ;;  %500 = vmatprep.subr.mxu1 %v264_v41  ;;  %v243_v63 = vld [vmem:[%s1953_s1 + $0x10] sm:$0xff]  ;;  %v366_v0 = vld [vmem:[%s1953_s1 + $0x3e8] sm:$0xff]  ;;  %v368_v1 = vld [vmem:[%s1953_s1 + $0x3f8] sm:$0xff] }
  0x21   : > { %412 = vmatpush1.msra.mxu0 %v261_v42  ;;  %501 = vmatpush1.msra.mxu1 %v263_v43  ;;  %v365_v2 = vld [vmem:[%s1953_s1 + $0x3e0] sm:$0xff]  ;;  %v367_v3 = vld [vmem:[%s1953_s1 + $0x3f0] sm:$0xff]  ;;  %v362_v4 = vld [vmem:[%s1953_s1 + $0x3c8] sm:$0xff] }
  0x22   : > { %413 = vmatprep.subr.mxu0 %v258_v44  ;;  %502 = vmatprep.subr.mxu1 %v260_v45  ;;  %v364_v5 = vld [vmem:[%s1953_s1 + $0x3d8] sm:$0xff]  ;;  %v361_v6 = vld [vmem:[%s1953_s1 + $0x3c0] sm:$0xff]  ;;  %v363_v7 = vld [vmem:[%s1953_s1 + $0x3d0] sm:$0xff] }
  0x23   : > { %414 = vmatpush1.msra.mxu0 %v257_v46  ;;  %503 = vmatpush1.msra.mxu1 %v259_v47  ;;  %v358_v8 = vld [vmem:[%s1953_s1 + $0x3a8] sm:$0xff]  ;;  %v360_v9 = vld [vmem:[%s1953_s1 + $0x3b8] sm:$0xff]  ;;  %v357_v10 = vld [vmem:[%s1953_s1 + $0x3a0] sm:$0xff] }
  0x24   : > { %415 = vmatprep.subr.mxu0 %v254_v48  ;;  %504 = vmatprep.subr.mxu1 %v256_v49  ;;  %v359_v11 = vld [vmem:[%s1953_s1 + $0x3b0] sm:$0xff]  ;;  %v354_v12 = vld [vmem:[%s1953_s1 + $0x388] sm:$0xff]  ;;  %v356_v13 = vld [vmem:[%s1953_s1 + $0x398] sm:$0xff] }
  0x25   : > { %416 = vmatpush1.msra.mxu0 %v253_v50  ;;  %505 = vmatpush1.msra.mxu1 %v255_v51  ;;  %v353_v14 = vld [vmem:[%s1953_s1 + $0x380] sm:$0xff]  ;;  %v355_v15 = vld [vmem:[%s1953_s1 + $0x390] sm:$0xff]  ;;  %v350_v16 = vld [vmem:[%s1953_s1 + $0x368] sm:$0xff] }
  0x26   : > { %417 = vmatprep.subr.mxu0 %v250_v52  ;;  %506 = vmatprep.subr.mxu1 %v252_v53  ;;  %v352_v17 = vld [vmem:[%s1953_s1 + $0x378] sm:$0xff]  ;;  %v349_v18 = vld [vmem:[%s1953_s1 + $0x360] sm:$0xff]  ;;  %v351_v19 = vld [vmem:[%s1953_s1 + $0x370] sm:$0xff] }
  0x27   : > { %418 = vmatpush1.msra.mxu0 %v249_v54  ;;  %507 = vmatpush1.msra.mxu1 %v251_v55  ;;  %v346_v20 = vld [vmem:[%s1953_s1 + $0x348] sm:$0xff]  ;;  %v348_v21 = vld [vmem:[%s1953_s1 + $0x358] sm:$0xff]  ;;  %v345_v22 = vld [vmem:[%s1953_s1 + $0x340] sm:$0xff] }
  0x28   : > { %419 = vmatprep.subr.mxu0 %v246_v56  ;;  %508 = vmatprep.subr.mxu1 %v248_v57  ;;  %v347_v23 = vld [vmem:[%s1953_s1 + $0x350] sm:$0xff]  ;;  %v342_v24 = vld [vmem:[%s1953_s1 + $0x328] sm:$0xff]  ;;  %v344_v25 = vld [vmem:[%s1953_s1 + $0x338] sm:$0xff] }
  0x29   : > { %420 = vmatpush1.msra.mxu0 %v245_v58  ;;  %509 = vmatpush1.msra.mxu1 %v247_v59  ;;  %v341_v26 = vld [vmem:[%s1953_s1 + $0x320] sm:$0xff]  ;;  %v343_v27 = vld [vmem:[%s1953_s1 + $0x330] sm:$0xff]  ;;  %v338_v28 = vld [vmem:[%s1953_s1 + $0x308] sm:$0xff] }
  0x2a   : > { %421 = vmatprep.subr.mxu0 %v242_v60  ;;  %510 = vmatprep.subr.mxu1 %v244_v61  ;;  %v340_v29 = vld [vmem:[%s1953_s1 + $0x318] sm:$0xff]  ;;  %v337_v30 = vld [vmem:[%s1953_s1 + $0x300] sm:$0xff]  ;;  %v339_v31 = vld [vmem:[%s1953_s1 + $0x310] sm:$0xff] }
  0x2b   : > { %422 = vmatpush1.msra.mxu0 %v241_v62  ;;  %511 = vmatpush1.msra.mxu1 %v243_v63  ;;  %v334_v32 = vld [vmem:[%s1953_s1 + $0x2e8] sm:$0xff]  ;;  %v336_v33 = vld [vmem:[%s1953_s1 + $0x2f8] sm:$0xff]  ;;  %v333_v34 = vld [vmem:[%s1953_s1 + $0x2e0] sm:$0xff] }
  0x2c   : > { %423 = vmatprep.subr.mxu0 %v366_v0  ;;  %512 = vmatprep.subr.mxu1 %v368_v1  ;;  %v335_v35 = vld [vmem:[%s1953_s1 + $0x2f0] sm:$0xff]  ;;  %v330_v36 = vld [vmem:[%s1953_s1 + $0x2c8] sm:$0xff]  ;;  %v332_v37 = vld [vmem:[%s1953_s1 + $0x2d8] sm:$0xff] }
  0x2d   : > { %424 = vmatpush2.msra.mxu0 %v365_v2  ;;  %513 = vmatpush2.msra.mxu1 %v367_v3  ;;  %v329_v38 = vld [vmem:[%s1953_s1 + $0x2c0] sm:$0xff]  ;;  %v331_v39 = vld [vmem:[%s1953_s1 + $0x2d0] sm:$0xff]  ;;  %v326_v40 = vld [vmem:[%s1953_s1 + $0x2a8] sm:$0xff] }
  0x2e   : > { %425 = vmatprep.subr.mxu0 %v362_v4  ;;  %514 = vmatprep.subr.mxu1 %v364_v5  ;;  %v328_v41 = vld [vmem:[%s1953_s1 + $0x2b8] sm:$0xff]  ;;  %v325_v42 = vld [vmem:[%s1953_s1 + $0x2a0] sm:$0xff]  ;;  %v327_v43 = vld [vmem:[%s1953_s1 + $0x2b0] sm:$0xff] }
  0x2f   : > { %426 = vmatpush2.msra.mxu0 %v361_v6  ;;  %515 = vmatpush2.msra.mxu1 %v363_v7  ;;  %v322_v44 = vld [vmem:[%s1953_s1 + $0x288] sm:$0xff]  ;;  %v324_v45 = vld [vmem:[%s1953_s1 + $0x298] sm:$0xff]  ;;  %v321_v46 = vld [vmem:[%s1953_s1 + $0x280] sm:$0xff] }
  0x30   : > { %427 = vmatprep.subr.mxu0 %v358_v8  ;;  %516 = vmatprep.subr.mxu1 %v360_v9  ;;  %v323_v47 = vld [vmem:[%s1953_s1 + $0x290] sm:$0xff]  ;;  %v318_v48 = vld [vmem:[%s1953_s1 + $0x268] sm:$0xff]  ;;  %v320_v49 = vld [vmem:[%s1953_s1 + $0x278] sm:$0xff] }
  0x31   : > { %428 = vmatpush2.msra.mxu0 %v357_v10  ;;  %517 = vmatpush2.msra.mxu1 %v359_v11  ;;  %v317_v50 = vld [vmem:[%s1953_s1 + $0x260] sm:$0xff]  ;;  %v319_v51 = vld [vmem:[%s1953_s1 + $0x270] sm:$0xff]  ;;  %v314_v52 = vld [vmem:[%s1953_s1 + $0x248] sm:$0xff] }
  0x32   : > { %429 = vmatprep.subr.mxu0 %v354_v12  ;;  %518 = vmatprep.subr.mxu1 %v356_v13  ;;  %v316_v53 = vld [vmem:[%s1953_s1 + $0x258] sm:$0xff]  ;;  %v313_v54 = vld [vmem:[%s1953_s1 + $0x240] sm:$0xff]  ;;  %v315_v55 = vld [vmem:[%s1953_s1 + $0x250] sm:$0xff] }
  0x33   : > { %430 = vmatpush2.msra.mxu0 %v353_v14  ;;  %519 = vmatpush2.msra.mxu1 %v355_v15  ;;  %v310_v56 = vld [vmem:[%s1953_s1 + $0x228] sm:$0xff]  ;;  %v312_v57 = vld [vmem:[%s1953_s1 + $0x238] sm:$0xff]  ;;  %v309_v58 = vld [vmem:[%s1953_s1 + $0x220] sm:$0xff] }
  0x34   : > { %431 = vmatprep.subr.mxu0 %v350_v16  ;;  %520 = vmatprep.subr.mxu1 %v352_v17  ;;  %v311_v59 = vld [vmem:[%s1953_s1 + $0x230] sm:$0xff]  ;;  %v306_v60 = vld [vmem:[%s1953_s1 + $0x208] sm:$0xff]  ;;  %v308_v61 = vld [vmem:[%s1953_s1 + $0x218] sm:$0xff] }
  0x35   : > { %432 = vmatpush2.msra.mxu0 %v349_v18  ;;  %521 = vmatpush2.msra.mxu1 %v351_v19  ;;  %v305_v62 = vld [vmem:[%s1953_s1 + $0x200] sm:$0xff]  ;;  %v234_v63 = vld [vmem:[%s1476_s12 + $0x8] sm:$0xff]  ;;  %v307_v0 = vld [vmem:[%s1953_s1 + $0x210] sm:$0xff] }
  0x36   : > { %433 = vmatprep.subr.mxu0 %v346_v20  ;;  %522 = vmatprep.subr.mxu1 %v348_v21  ;;  %v233_v1 = vld [vmem:[%s1476_s12] sm:$0xff]  ;;  %v236_v2 = vld [vmem:[%s1476_s12 + $0x18] sm:$0xff]  ;;  %v647_v5 = vld [vmem:[%s1955_s3 + $0xf0] sm:$0xff] }
  0x37   : > { %434 = vmatpush2.msra.mxu0 %v345_v22  ;;  %523 = vmatpush2.msra.mxu1 %v347_v23  ;;  %v648_v3 = vld [vmem:[%s1955_s3 + $0xf8] sm:$0xff]  ;;  %v711_v6 = vld [vmem:[%s1955_s3 + $0x2f0] sm:$0xff]  ;;  %v238_v8 = vld [vmem:[%s1476_s12 + $0x28] sm:$0xff] }
  0x38   : > { %435 = vmatprep.subr.mxu0 %v342_v24  ;;  %524 = vmatprep.subr.mxu1 %v344_v25  ;;  %v712_v4 = vld [vmem:[%s1955_s3 + $0x2f8] sm:$0xff]  ;;  %v235_v7 = vld [vmem:[%s1476_s12 + $0x10] sm:$0xff]  ;;  %v646_v9 = vld [vmem:[%s1955_s3 + $0xe8] sm:$0xff] }
  0x39   : > { %436 = vmatpush2.msra.mxu0 %v341_v26  ;;  %525 = vmatpush2.msra.mxu1 %v343_v27  ;;  %v710_v10 = vld [vmem:[%s1955_s3 + $0x2e8] sm:$0xff]  ;;  %v645_v11 = vld [vmem:[%s1955_s3 + $0xe0] sm:$0xff]  ;;  %v240_v14 = vld [vmem:[%s1476_s12 + $0x38] sm:$0xff] }
  0x3a   : > { %437 = vmatprep.subr.mxu0 %v338_v28  ;;  %526 = vmatprep.subr.mxu1 %v340_v29  ;;  %v709_v12 = vld [vmem:[%s1955_s3 + $0x2e0] sm:$0xff]  ;;  %v644_v15 = vld [vmem:[%s1955_s3 + $0xd8] sm:$0xff]  ;;  %v643_v17 = vld [vmem:[%s1955_s3 + $0xd0] sm:$0xff] }
  0x3b   : > { %438 = vmatpush2.msra.mxu0 %v337_v30  ;;  %527 = vmatpush2.msra.mxu1 %v339_v31  ;;  %v237_v13 = vld [vmem:[%s1476_s12 + $0x20] sm:$0xff]  ;;  %v708_v16 = vld [vmem:[%s1955_s3 + $0x2d8] sm:$0xff]  ;;  %v707_v18 = vld [vmem:[%s1955_s3 + $0x2d0] sm:$0xff] }
  0x3c   : > { %439 = vmatprep.subr.mxu0 %v334_v32  ;;  %528 = vmatprep.subr.mxu1 %v336_v33  ;;  %v239_v19 = vld [vmem:[%s1476_s12 + $0x30] sm:$0xff]  ;;  %v642_v20 = vld [vmem:[%s1955_s3 + $0xc8] sm:$0xff]  ;;  %v641_v22 = vld [vmem:[%s1955_s3 + $0xc0] sm:$0xff] }
  0x3d   : > { %440 = vmatpush2.msra.mxu0 %v333_v34  ;;  %529 = vmatpush2.msra.mxu1 %v335_v35  ;;  %v706_v21 = vld [vmem:[%s1955_s3 + $0x2c8] sm:$0xff]  ;;  %v705_v23 = vld [vmem:[%s1955_s3 + $0x2c0] sm:$0xff]  ;;  %v640_v24 = vld [vmem:[%s1955_s3 + $0xb8] sm:$0xff] }
  0x3e   : > { %441 = vmatprep.subr.mxu0 %v330_v36  ;;  %530 = vmatprep.subr.mxu1 %v332_v37  ;;  %v704_v25 = vld [vmem:[%s1955_s3 + $0x2b8] sm:$0xff]  ;;  %v639_v26 = vld [vmem:[%s1955_s3 + $0xb0] sm:$0xff]  ;;  %v638_v28 = vld [vmem:[%s1955_s3 + $0xa8] sm:$0xff] }
  0x3f   : > { %442 = vmatpush2.msra.mxu0 %v329_v38  ;;  %531 = vmatpush2.msra.mxu1 %v331_v39  ;;  %v703_v27 = vld [vmem:[%s1955_s3 + $0x2b0] sm:$0xff]  ;;  %v702_v29 = vld [vmem:[%s1955_s3 + $0x2a8] sm:$0xff]  ;;  %v637_v30 = vld [vmem:[%s1955_s3 + $0xa0] sm:$0xff] }
  0x40   : > { %443 = vmatprep.subr.mxu0 %v326_v40  ;;  %532 = vmatprep.subr.mxu1 %v328_v41  ;;  %v701_v31 = vld [vmem:[%s1955_s3 + $0x2a0] sm:$0xff]  ;;  %v636_v32 = vld [vmem:[%s1955_s3 + $0x98] sm:$0xff]  ;;  %v635_v34 = vld [vmem:[%s1955_s3 + $0x90] sm:$0xff] }
  0x41   : > { %444 = vmatpush2.msra.mxu0 %v325_v42  ;;  %533 = vmatpush2.msra.mxu1 %v327_v43  ;;  %v700_v33 = vld [vmem:[%s1955_s3 + $0x298] sm:$0xff]  ;;  %v699_v35 = vld [vmem:[%s1955_s3 + $0x290] sm:$0xff]  ;;  %v634_v36 = vld [vmem:[%s1955_s3 + $0x88] sm:$0xff] }
  0x42   : > { %445 = vmatprep.subr.mxu0 %v322_v44  ;;  %534 = vmatprep.subr.mxu1 %v324_v45  ;;  %v698_v37 = vld [vmem:[%s1955_s3 + $0x288] sm:$0xff]  ;;  %v633_v38 = vld [vmem:[%s1955_s3 + $0x80] sm:$0xff]  ;;  %v632_v40 = vld [vmem:[%s1955_s3 + $0x78] sm:$0xff] }
  0x43   : > { %446 = vmatpush2.msra.mxu0 %v321_v46  ;;  %535 = vmatpush2.msra.mxu1 %v323_v47  ;;  %v697_v39 = vld [vmem:[%s1955_s3 + $0x280] sm:$0xff]  ;;  %v696_v41 = vld [vmem:[%s1955_s3 + $0x278] sm:$0xff]  ;;  %v631_v42 = vld [vmem:[%s1955_s3 + $0x70] sm:$0xff] }
  0x44   : > { %447 = vmatprep.subr.mxu0 %v318_v48  ;;  %536 = vmatprep.subr.mxu1 %v320_v49  ;;  %v695_v43 = vld [vmem:[%s1955_s3 + $0x270] sm:$0xff]  ;;  %v630_v44 = vld [vmem:[%s1955_s3 + $0x68] sm:$0xff]  ;;  %v629_v46 = vld [vmem:[%s1955_s3 + $0x60] sm:$0xff] }
  0x45   : > { %448 = vmatpush2.msra.mxu0 %v317_v50  ;;  %537 = vmatpush2.msra.mxu1 %v319_v51  ;;  %v694_v45 = vld [vmem:[%s1955_s3 + $0x268] sm:$0xff]  ;;  %v693_v47 = vld [vmem:[%s1955_s3 + $0x260] sm:$0xff]  ;;  %v628_v48 = vld [vmem:[%s1955_s3 + $0x58] sm:$0xff] }
  0x46   : > { %449 = vmatprep.subr.mxu0 %v314_v52  ;;  %538 = vmatprep.subr.mxu1 %v316_v53  ;;  %v692_v49 = vld [vmem:[%s1955_s3 + $0x258] sm:$0xff]  ;;  %v627_v50 = vld [vmem:[%s1955_s3 + $0x50] sm:$0xff]  ;;  %v626_v52 = vld [vmem:[%s1955_s3 + $0x48] sm:$0xff] }
  0x47   : > { %450 = vmatpush2.msra.mxu0 %v313_v54  ;;  %539 = vmatpush2.msra.mxu1 %v315_v55  ;;  %v691_v51 = vld [vmem:[%s1955_s3 + $0x250] sm:$0xff]  ;;  %v690_v53 = vld [vmem:[%s1955_s3 + $0x248] sm:$0xff]  ;;  %v625_v54 = vld [vmem:[%s1955_s3 + $0x40] sm:$0xff] }
  0x48   : > { %451 = vmatprep.subr.mxu0 %v310_v56  ;;  %540 = vmatprep.subr.mxu1 %v312_v57  ;;  %v689_v55 = vld [vmem:[%s1955_s3 + $0x240] sm:$0xff]  ;;  %v624_v56 = vld [vmem:[%s1955_s3 + $0x38] sm:$0xff] }
  0x49   : > { %452 = vmatpush2.msra.mxu0 %v309_v58  ;;  %541 = vmatpush2.msra.mxu1 %v311_v59  ;;  %v688_v57 = vld [vmem:[%s1955_s3 + $0x238] sm:$0xff]  ;;  %v623_v58 = vld [vmem:[%s1955_s3 + $0x30] sm:$0xff] }
  0x4a   : > { %453 = vmatprep.subr.mxu0 %v306_v60  ;;  %542 = vmatprep.subr.mxu1 %v308_v61  ;;  %v687_v59 = vld [vmem:[%s1955_s3 + $0x230] sm:$0xff]  ;;  %v622_v60 = vld [vmem:[%s1955_s3 + $0x28] sm:$0xff] }
  0x4b   : > { %454 = vmatpush2.msra.mxu0 %v305_v62  ;;  %455 = vmatprep.mubr.f32.mxu0 %v234_v63  ;;  %v686_v61 = vld [vmem:[%s1955_s3 + $0x228] sm:$0xff]  ;;  %v621_v62 = vld [vmem:[%s1955_s3 + $0x20] sm:$0xff] }
  0x4c   : > { %543 = vmatpush2.msra.mxu1 %v307_v0  ;;  %544 = vmatprep.mubr.f32.mxu1 %v234_v63  ;;  %v685_v63 = vld [vmem:[%s1955_s3 + $0x220] sm:$0xff]  ;;  %v620_v0 = vld [vmem:[%s1955_s3 + $0x18] sm:$0xff] }
  0x4d   : > { %456 = vmatmul.mubr.f32.vlgmr.msra.gmra.mxu0 %v233_v1  ;;  %545 = vmatmul.mubr.f32.vlgmr.msra.gmra.mxu1 %v233_v1  ;;  %v684_v1 = vld [vmem:[%s1955_s3 + $0x218] sm:$0xff] }
  0x4e   : > { %461 = vmatprep.mubr.f32.mxu0 %v236_v2  ;;  %550 = vmatprep.mubr.f32.mxu1 %v236_v2  ;;  %v619_v2 = vld [vmem:[%s1955_s3 + $0x10] sm:$0xff] }
  0x4f   : > { %757 = vmatprep.subr.mxu0 %v648_v3  ;;  %846 = vmatprep.subr.mxu1 %v712_v4  ;;  %v683_v3 = vld [vmem:[%s1955_s3 + $0x210] sm:$0xff]  ;;  %v618_v4 = vld [vmem:[%s1955_s3 + $0x8] sm:$0xff] }
  0x50   : > { %758 = vmatpush1.msra.mxu0 %v647_v5  ;;  %847 = vmatpush1.msra.mxu1 %v711_v6  ;;  %v682_v5 = vld [vmem:[%s1955_s3 + $0x208] sm:$0xff]  ;;  %v617_v6 = vld [vmem:[%s1955_s3] sm:$0xff] }
  0x51   : > { %462 = vmatmul.mubr.f32.gmra.mxu0 %v235_v7  ;;  %551 = vmatmul.mubr.f32.gmra.mxu1 %v235_v7  ;;  %v681_v7 = vld [vmem:[%s1955_s3 + $0x200] sm:$0xff] }
  0x52   : > { %467 = vmatprep.mubr.f32.mxu0 %v238_v8  ;;  %556 = vmatprep.mubr.f32.mxu1 %v238_v8  ;;  %v680_v8 = vld [vmem:[%s1955_s3 + $0x1f8] sm:$0xff] }
  0x53   : > { %759 = vmatprep.subr.mxu0 %v646_v9  ;;  %848 = vmatprep.subr.mxu1 %v710_v10  ;;  %v744_v9 = vld [vmem:[%s1955_s3 + $0x3f8] sm:$0xff]  ;;  %v679_v10 = vld [vmem:[%s1955_s3 + $0x1f0] sm:$0xff] }
  0x54   : > { %760 = vmatpush1.msra.mxu0 %v645_v11  ;;  %849 = vmatpush1.msra.mxu1 %v709_v12  ;;  %v743_v11 = vld [vmem:[%s1955_s3 + $0x3f0] sm:$0xff]  ;;  %v678_v12 = vld [vmem:[%s1955_s3 + $0x1e8] sm:$0xff] }
  0x55   : > { %468 = vmatmul.mubr.f32.gmra.mxu0 %v237_v13  ;;  %557 = vmatmul.mubr.f32.gmra.mxu1 %v237_v13  ;;  %v742_v13 = vld [vmem:[%s1955_s3 + $0x3e8] sm:$0xff] }
  0x56   : > { %473 = vmatprep.mubr.f32.mxu0 %v240_v14  ;;  %562 = vmatprep.mubr.f32.mxu1 %v240_v14  ;;  %v677_v14 = vld [vmem:[%s1955_s3 + $0x1e0] sm:$0xff] }
  0x57   : > { %761 = vmatprep.subr.mxu0 %v644_v15  ;;  %850 = vmatprep.subr.mxu1 %v708_v16  ;;  %v741_v15 = vld [vmem:[%s1955_s3 + $0x3e0] sm:$0xff]  ;;  %v676_v16 = vld [vmem:[%s1955_s3 + $0x1d8] sm:$0xff] }
  0x58   : > { %762 = vmatpush1.msra.mxu0 %v643_v17  ;;  %851 = vmatpush1.msra.mxu1 %v707_v18  ;;  %v740_v17 = vld [vmem:[%s1955_s3 + $0x3d8] sm:$0xff]  ;;  %v675_v18 = vld [vmem:[%s1955_s3 + $0x1d0] sm:$0xff] }
  0x59   : > { %474 = vmatmul.mubr.f32.gmra.mxu0 %v239_v19  ;;  %563 = vmatmul.mubr.f32.gmra.mxu1 %v239_v19  ;;  %v739_v19 = vld [vmem:[%s1955_s3 + $0x3d0] sm:$0xff] }
  0x5a   : > { %763 = vmatprep.subr.mxu0 %v642_v20  ;;  %852 = vmatprep.subr.mxu1 %v706_v21  ;;  %v674_v20 = vld [vmem:[%s1955_s3 + $0x1c8] sm:$0xff] }
  0x5b   : > { %764 = vmatpush1.msra.mxu0 %v641_v22  ;;  %853 = vmatpush1.msra.mxu1 %v705_v23  ;;  %v738_v21 = vld [vmem:[%s1955_s3 + $0x3c8] sm:$0xff]  ;;  %v673_v22 = vld [vmem:[%s1955_s3 + $0x1c0] sm:$0xff] }
  0x5c   : > { %765 = vmatprep.subr.mxu0 %v640_v24  ;;  %854 = vmatprep.subr.mxu1 %v704_v25  ;;  %v737_v23 = vld [vmem:[%s1955_s3 + $0x3c0] sm:$0xff]  ;;  %v672_v24 = vld [vmem:[%s1955_s3 + $0x1b8] sm:$0xff] }
  0x5d   : > { %766 = vmatpush1.msra.mxu0 %v639_v26  ;;  %855 = vmatpush1.msra.mxu1 %v703_v27  ;;  %v736_v25 = vld [vmem:[%s1955_s3 + $0x3b8] sm:$0xff]  ;;  %v671_v26 = vld [vmem:[%s1955_s3 + $0x1b0] sm:$0xff] }
  0x5e   : > { %767 = vmatprep.subr.mxu0 %v638_v28  ;;  %856 = vmatprep.subr.mxu1 %v702_v29  ;;  %v735_v27 = vld [vmem:[%s1955_s3 + $0x3b0] sm:$0xff]  ;;  %v670_v28 = vld [vmem:[%s1955_s3 + $0x1a8] sm:$0xff] }
  0x5f   : > { %768 = vmatpush1.msra.mxu0 %v637_v30  ;;  %857 = vmatpush1.msra.mxu1 %v701_v31  ;;  %v734_v29 = vld [vmem:[%s1955_s3 + $0x3a8] sm:$0xff]  ;;  %v669_v30 = vld [vmem:[%s1955_s3 + $0x1a0] sm:$0xff] }
  0x60   : > { %769 = vmatprep.subr.mxu0 %v636_v32  ;;  %858 = vmatprep.subr.mxu1 %v700_v33  ;;  %v733_v31 = vld [vmem:[%s1955_s3 + $0x3a0] sm:$0xff]  ;;  %v668_v32 = vld [vmem:[%s1955_s3 + $0x198] sm:$0xff] }
  0x61   : > { %770 = vmatpush1.msra.mxu0 %v635_v34  ;;  %859 = vmatpush1.msra.mxu1 %v699_v35  ;;  %v732_v33 = vld [vmem:[%s1955_s3 + $0x398] sm:$0xff]  ;;  %v667_v34 = vld [vmem:[%s1955_s3 + $0x190] sm:$0xff] }
  0x62   : > { %771 = vmatprep.subr.mxu0 %v634_v36  ;;  %860 = vmatprep.subr.mxu1 %v698_v37  ;;  %v731_v35 = vld [vmem:[%s1955_s3 + $0x390] sm:$0xff]  ;;  %v666_v36 = vld [vmem:[%s1955_s3 + $0x188] sm:$0xff] }
  0x63   : > { %772 = vmatpush1.msra.mxu0 %v633_v38  ;;  %861 = vmatpush1.msra.mxu1 %v697_v39  ;;  %v730_v37 = vld [vmem:[%s1955_s3 + $0x388] sm:$0xff]  ;;  %v665_v38 = vld [vmem:[%s1955_s3 + $0x180] sm:$0xff] }
  0x64   : > { %773 = vmatprep.subr.mxu0 %v632_v40  ;;  %862 = vmatprep.subr.mxu1 %v696_v41  ;;  %v729_v39 = vld [vmem:[%s1955_s3 + $0x380] sm:$0xff]  ;;  %v664_v40 = vld [vmem:[%s1955_s3 + $0x178] sm:$0xff] }
  0x65   : > { %774 = vmatpush1.msra.mxu0 %v631_v42  ;;  %863 = vmatpush1.msra.mxu1 %v695_v43  ;;  %v728_v41 = vld [vmem:[%s1955_s3 + $0x378] sm:$0xff]  ;;  %v663_v42 = vld [vmem:[%s1955_s3 + $0x170] sm:$0xff] }
  0x66   : > { %775 = vmatprep.subr.mxu0 %v630_v44  ;;  %864 = vmatprep.subr.mxu1 %v694_v45  ;;  %v727_v43 = vld [vmem:[%s1955_s3 + $0x370] sm:$0xff]  ;;  %v662_v44 = vld [vmem:[%s1955_s3 + $0x168] sm:$0xff] }
  0x67   : > { %776 = vmatpush1.msra.mxu0 %v629_v46  ;;  %865 = vmatpush1.msra.mxu1 %v693_v47  ;;  %v726_v45 = vld [vmem:[%s1955_s3 + $0x368] sm:$0xff]  ;;  %v661_v46 = vld [vmem:[%s1955_s3 + $0x160] sm:$0xff] }
  0x68   : > { %777 = vmatprep.subr.mxu0 %v628_v48  ;;  %866 = vmatprep.subr.mxu1 %v692_v49  ;;  %v725_v47 = vld [vmem:[%s1955_s3 + $0x360] sm:$0xff]  ;;  %v660_v48 = vld [vmem:[%s1955_s3 + $0x158] sm:$0xff] }
  0x69   : > { %778 = vmatpush1.msra.mxu0 %v627_v50  ;;  %867 = vmatpush1.msra.mxu1 %v691_v51  ;;  %v724_v49 = vld [vmem:[%s1955_s3 + $0x358] sm:$0xff]  ;;  %v659_v50 = vld [vmem:[%s1955_s3 + $0x150] sm:$0xff] }
  0x6a   : > { %779 = vmatprep.subr.mxu0 %v626_v52  ;;  %868 = vmatprep.subr.mxu1 %v690_v53  ;;  %v723_v51 = vld [vmem:[%s1955_s3 + $0x350] sm:$0xff]  ;;  %v658_v52 = vld [vmem:[%s1955_s3 + $0x148] sm:$0xff] }
  0x6b   : > { %780 = vmatpush1.msra.mxu0 %v625_v54  ;;  %869 = vmatpush1.msra.mxu1 %v689_v55  ;;  %v722_v53 = vld [vmem:[%s1955_s3 + $0x348] sm:$0xff]  ;;  %v657_v54 = vld [vmem:[%s1955_s3 + $0x140] sm:$0xff] }
  0x6c   : > { %781 = vmatprep.subr.mxu0 %v624_v56  ;;  %870 = vmatprep.subr.mxu1 %v688_v57  ;;  %v721_v55 = vld [vmem:[%s1955_s3 + $0x340] sm:$0xff]  ;;  %v656_v56 = vld [vmem:[%s1955_s3 + $0x138] sm:$0xff] }
  0x6d   : > { %782 = vmatpush1.msra.mxu0 %v623_v58  ;;  %871 = vmatpush1.msra.mxu1 %v687_v59  ;;  %v720_v57 = vld [vmem:[%s1955_s3 + $0x338] sm:$0xff]  ;;  %v655_v58 = vld [vmem:[%s1955_s3 + $0x130] sm:$0xff] }
  0x6e   : > { %783 = vmatprep.subr.mxu0 %v622_v60  ;;  %872 = vmatprep.subr.mxu1 %v686_v61  ;;  %v719_v59 = vld [vmem:[%s1955_s3 + $0x330] sm:$0xff]  ;;  %v654_v60 = vld [vmem:[%s1955_s3 + $0x128] sm:$0xff] }
  0x6f   : > { %784 = vmatpush1.msra.mxu0 %v621_v62  ;;  %873 = vmatpush1.msra.mxu1 %v685_v63  ;;  %v718_v61 = vld [vmem:[%s1955_s3 + $0x328] sm:$0xff]  ;;  %v653_v62 = vld [vmem:[%s1955_s3 + $0x120] sm:$0xff] }
  0x70   : > { %785 = vmatprep.subr.mxu0 %v620_v0  ;;  %874 = vmatprep.subr.mxu1 %v684_v1  ;;  %v717_v63 = vld [vmem:[%s1955_s3 + $0x320] sm:$0xff]  ;;  %v652_v0 = vld [vmem:[%s1955_s3 + $0x118] sm:$0xff] }
  0x71   : > { %786 = vmatpush1.msra.mxu0 %v619_v2  ;;  %875 = vmatpush1.msra.mxu1 %v683_v3  ;;  %v716_v1 = vld [vmem:[%s1955_s3 + $0x318] sm:$0xff]  ;;  %v651_v2 = vld [vmem:[%s1955_s3 + $0x110] sm:$0xff] }
  0x72   : > { %787 = vmatprep.subr.mxu0 %v618_v4  ;;  %876 = vmatprep.subr.mxu1 %v682_v5  ;;  %v715_v3 = vld [vmem:[%s1955_s3 + $0x310] sm:$0xff]  ;;  %v650_v4 = vld [vmem:[%s1955_s3 + $0x108] sm:$0xff] }
  0x73   : > { %788 = vmatpush1.msra.mxu0 %v617_v6  ;;  %877 = vmatpush1.msra.mxu1 %v681_v7  ;;  %v714_v5 = vld [vmem:[%s1955_s3 + $0x308] sm:$0xff]  ;;  %v649_v6 = vld [vmem:[%s1955_s3 + $0x100] sm:$0xff] }
  0x74   : > { %789 = vmatprep.subr.mxu0 %v680_v8  ;;  %878 = vmatprep.subr.mxu1 %v744_v9  ;;  %v713_v7 = vld [vmem:[%s1955_s3 + $0x300] sm:$0xff]  ;;  %v371_v8 = vlaneseq }
  0x75   : > { %790 = vmatpush2.msra.mxu0 %v679_v10  ;;  %879 = vmatpush2.msra.mxu1 %v743_v11 }
  0x76   : > { %791 = vmatprep.subr.mxu0 %v678_v12  ;;  %880 = vmatprep.subr.mxu1 %v742_v13  ;;  %v1888_v9 = vshrl.u32 %v371_v8, 7  ;;  %v369_v12 = vld [vmem:[%s1954_s2] sm:$0xf] }
  0x77   : > { %792 = vmatpush2.msra.mxu0 %v677_v14  ;;  %881 = vmatpush2.msra.mxu1 %v741_v15 }
  0x78   : > { %793 = vmatprep.subr.mxu0 %v676_v16  ;;  %882 = vmatprep.subr.mxu1 %v740_v17  ;;  %v373_v10 = vsub.s32 0, %v1888_v9  ;;  %v381_v11 = vsub.s32 2, %v1888_v9  ;;  %v377_v13 = vsub.s32 1, %v1888_v9  ;;  %v385_v14 = vsub.s32 3, %v1888_v9 }
  0x79   : > { %794 = vmatpush2.msra.mxu0 %v675_v18  ;;  %883 = vmatpush2.msra.mxu1 %v739_v19 }
  0x7a   : > { %795 = vmatprep.subr.mxu0 %v674_v20  ;;  %884 = vmatprep.subr.mxu1 %v738_v21  ;;  %v1899_v15 = vrot.slane %v369_v12, %v373_v10  ;;  %v1901_v16 = vrot.slane %v369_v12, %v381_v11  ;;  %v1905_v19 = vrot.slane %v369_v12, %v377_v13 }
  0x7b   : > { %796 = vmatpush2.msra.mxu0 %v673_v22  ;;  %885 = vmatpush2.msra.mxu1 %v737_v23  ;;  %v1907_v20 = vrot.slane %v369_v12, %v385_v14 }
  0x7c   : > { %797 = vmatprep.subr.mxu0 %v672_v24  ;;  %886 = vmatprep.subr.mxu1 %v736_v25 }
  0x7d   : > { %798 = vmatpush2.msra.mxu0 %v671_v26  ;;  %887 = vmatpush2.msra.mxu1 %v735_v27 }
  0x7e   : > { %799 = vmatprep.subr.mxu0 %v670_v28  ;;  %888 = vmatprep.subr.mxu1 %v734_v29 }
  0x7f   : > { %800 = vmatpush2.msra.mxu0 %v669_v30  ;;  %889 = vmatpush2.msra.mxu1 %v733_v31 }
  0x80   : > { %801 = vmatprep.subr.mxu0 %v668_v32  ;;  %890 = vmatprep.subr.mxu1 %v732_v33 }
  0x81   : > { %802 = vmatpush2.msra.mxu0 %v667_v34  ;;  %891 = vmatpush2.msra.mxu1 %v731_v35 }
  0x82   : > { %803 = vmatprep.subr.mxu0 %v666_v36  ;;  %892 = vmatprep.subr.mxu1 %v730_v37 }
  0x83   : > { %804 = vmatpush2.msra.mxu0 %v665_v38  ;;  %893 = vmatpush2.msra.mxu1 %v729_v39 }
  0x84   : > { %805 = vmatprep.subr.mxu0 %v664_v40  ;;  %894 = vmatprep.subr.mxu1 %v728_v41 }
  0x85   : > { %806 = vmatpush2.msra.mxu0 %v663_v42  ;;  %895 = vmatpush2.msra.mxu1 %v727_v43 }
  0x86   : > { %807 = vmatprep.subr.mxu0 %v662_v44  ;;  %896 = vmatprep.subr.mxu1 %v726_v45 }
  0x87   : > { %808 = vmatpush2.msra.mxu0 %v661_v46  ;;  %897 = vmatpush2.msra.mxu1 %v725_v47 }
  0x88   : > { %809 = vmatprep.subr.mxu0 %v660_v48  ;;  %898 = vmatprep.subr.mxu1 %v724_v49 }
  0x89   : > { %810 = vmatpush2.msra.mxu0 %v659_v50  ;;  %899 = vmatpush2.msra.mxu1 %v723_v51 }
  0x8a   : > { %811 = vmatprep.subr.mxu0 %v658_v52  ;;  %900 = vmatprep.subr.mxu1 %v722_v53 }
  0x8b   : > { %812 = vmatpush2.msra.mxu0 %v657_v54  ;;  %901 = vmatpush2.msra.mxu1 %v721_v55 }
  0x8c   : > { %813 = vmatprep.subr.mxu0 %v656_v56  ;;  %902 = vmatprep.subr.mxu1 %v720_v57 }
  0x8d   : > { %814 = vmatpush2.msra.mxu0 %v655_v58  ;;  %903 = vmatpush2.msra.mxu1 %v719_v59 }
  0x8e   : > { %815 = vmatprep.subr.mxu0 %v654_v60  ;;  %904 = vmatprep.subr.mxu1 %v718_v61 }
  0x8f   : > { %816 = vmatpush2.msra.mxu0 %v653_v62  ;;  %905 = vmatpush2.msra.mxu1 %v717_v63 }
  0x90   : > { %817 = vmatprep.subr.mxu0 %v652_v0  ;;  %906 = vmatprep.subr.mxu1 %v716_v1 }
  0x91   : > { %818 = vmatpush2.msra.mxu0 %v651_v2  ;;  %907 = vmatpush2.msra.mxu1 %v715_v3 }
  0x92   : > { %819 = vmatprep.subr.mxu0 %v650_v4  ;;  %908 = vmatprep.subr.mxu1 %v714_v5 }
  0x93   : > { %820 = vmatpush2.msra.mxu0 %v649_v6  ;;  %909 = vmatpush2.msra.mxu1 %v713_v7 }
 0x10d   : > { %v457_v17 = vpop.f32.mrf.mxu0  ;;  %v546_v18 = vpop.f32.mrf.mxu1 }
 0x10e   : > { %v458_v21 = vadd.f32 %v457_v17, %v1899_v15  ;;  %v547_v22 = vadd.f32 %v546_v18, %v1901_v16 }
 0x10f   : > { %v459_v23 = vpop.f32.mrf.mxu0  ;;  %v548_v24 = vpop.f32.mrf.mxu1 }
 0x110   : > { %vm569_vm0 = vcmp.gt.f32.partialorder %v458_v21, 0.0  ;;  %v585_v25 = vmul.f32 0.01, %v458_v21  ;;  %vm571_vm1 = vcmp.gt.f32.partialorder %v547_v22, 0.0  ;;  %v587_v26 = vmul.f32 0.01, %v547_v22 }
 0x111   : > { %v460_v27 = vadd.f32 %v459_v23, %v1905_v19  ;;  %v549_v28 = vadd.f32 %v548_v24, %v1907_v20  ;;  %v463_v29 = vpop.f32.mrf.mxu0  ;;  %v552_v30 = vpop.f32.mrf.mxu1 }
 0x112   : > { %v601_v31 = vsel %vm569_vm0, %v458_v21, %v585_v25  ;;  %v603_v32 = vsel %vm571_vm1, %v547_v22, %v587_v26  ;;  %v464_v33 = vadd.f32 %v463_v29, %v1899_v15  ;;  %v553_v34 = vadd.f32 %v552_v30, %v1901_v16  ;;  %v745_v22 = vld [vmem:[%s1956_s4] sm:$0x3] }
 0x113   : > { %v586_v35 = vmul.f32 0.01, %v460_v27  ;;  %v588_v36 = vmul.f32 0.01, %v549_v28  ;;  %v465_v37 = vpop.f32.mrf.mxu0  ;;  %v554_v38 = vpop.f32.mrf.mxu1  ;;  %vm570_vm2 = vcmp.gt.f32.partialorder %v460_v27, 0.0  ;;  %vm572_vm3 = vcmp.gt.f32.partialorder %v549_v28, 0.0 }
 0x114   : > { %v589_v39 = vmul.f32 0.01, %v464_v33  ;;  %v591_v40 = vmul.f32 0.01, %v553_v34  ;;  %v466_v41 = vadd.f32 %v465_v37, %v1905_v19  ;;  %v555_v42 = vadd.f32 %v554_v38, %v1907_v20 }
 0x115   : > { %v469_v43 = vpop.f32.mrf.mxu0  ;;  %v558_v44 = vpop.f32.mrf.mxu1  ;;  %v602_v45 = vsel %vm570_vm2, %v460_v27, %v586_v35  ;;  %v604_v46 = vsel %vm572_vm3, %v549_v28, %v588_v36  ;;  %vm573_vm4 = vcmp.gt.f32.partialorder %v464_v33, 0.0  ;;  %vm575_vm5 = vcmp.gt.f32.partialorder %v553_v34, 0.0 }
 0x116   : > { %v590_v47 = vmul.f32 0.01, %v466_v41  ;;  %v592_v48 = vmul.f32 0.01, %v555_v42  ;;  %v470_v49 = vadd.f32 %v469_v43, %v1899_v15  ;;  %v559_v50 = vadd.f32 %v558_v44, %v1901_v16  ;;  %821 = vmatprep.mubr.f32.mxu0 %v602_v45  ;;  %910 = vmatprep.mubr.f32.mxu1 %v604_v46 }
 0x117   : > { %822 = vmatmul.mubr.f32.vlgmr.msra.gmra.mxu0 %v601_v31  ;;  %911 = vmatmul.mubr.f32.vlgmr.msra.gmra.mxu1 %v603_v32  ;;  %v471_v51 = vpop.f32.mrf.mxu0  ;;  %v560_v52 = vpop.f32.mrf.mxu1  ;;  %vm574_vm6 = vcmp.gt.f32.partialorder %v466_v41, 0.0  ;;  %vm576_vm7 = vcmp.gt.f32.partialorder %v555_v42, 0.0  ;;  %v605_v53 = vsel %vm573_vm4, %v464_v33, %v589_v39  ;;  %v607_v54 = vsel %vm575_vm5, %v553_v34, %v591_v40 }
 0x118   : > { %v593_v55 = vmul.f32 0.01, %v470_v49  ;;  %v595_v56 = vmul.f32 0.01, %v559_v50  ;;  %v472_v57 = vadd.f32 %v471_v51, %v1905_v19  ;;  %v561_v58 = vadd.f32 %v560_v52, %v1907_v20 }
 0x119   : > { %v475_v59 = vpop.f32.mrf.mxu0  ;;  %v564_v60 = vpop.f32.mrf.mxu1  ;;  %v606_v61 = vsel %vm574_vm6, %v466_v41, %v590_v47  ;;  %v608_v62 = vsel %vm576_vm7, %v555_v42, %v592_v48  ;;  %vm577_vm8 = vcmp.gt.f32.partialorder %v470_v49, 0.0  ;;  %vm579_vm9 = vcmp.gt.f32.partialorder %v559_v50, 0.0 }
 0x11a   : > { %v594_v63 = vmul.f32 0.01, %v472_v57  ;;  %v596_v0 = vmul.f32 0.01, %v561_v58  ;;  %v476_v1 = vadd.f32 %v475_v59, %v1899_v15  ;;  %v565_v2 = vadd.f32 %v564_v60, %v1901_v16  ;;  %827 = vmatprep.mubr.f32.mxu0 %v606_v61  ;;  %916 = vmatprep.mubr.f32.mxu1 %v608_v62 }
 0x11b   : > { %828 = vmatmul.mubr.f32.gmra.mxu0 %v605_v53  ;;  %917 = vmatmul.mubr.f32.gmra.mxu1 %v607_v54  ;;  %v477_v3 = vpop.f32.mrf.mxu0  ;;  %v566_v4 = vpop.f32.mrf.mxu1  ;;  %vm578_vm10 = vcmp.gt.f32.partialorder %v472_v57, 0.0  ;;  %vm580_vm11 = vcmp.gt.f32.partialorder %v561_v58, 0.0  ;;  %v609_v7 = vsel %vm577_vm8, %v470_v49, %v593_v55  ;;  %v611_v8 = vsel %vm579_vm9, %v559_v50, %v595_v56 }
 0x11c   : > { %v478_v5 = vadd.f32 %v477_v3, %v1905_v19  ;;  %v567_v6 = vadd.f32 %v566_v4, %v1907_v20  ;;  %v597_v11 = vmul.f32 0.01, %v476_v1  ;;  %v599_v12 = vmul.f32 0.01, %v565_v2 }
 0x11d   : > { %v610_v14 = vsel %vm578_vm10, %v472_v57, %v594_v63  ;;  %v612_v15 = vsel %vm580_vm11, %v561_v58, %v596_v0  ;;  %vm581_vm14 = vcmp.gt.f32.partialorder %v476_v1, 0.0  ;;  %vm583_vm15 = vcmp.gt.f32.partialorder %v565_v2, 0.0 }
 0x11e   : > { %v598_v16 = vmul.f32 0.01, %v478_v5  ;;  %v600_v17 = vmul.f32 0.01, %v567_v6  ;;  %833 = vmatprep.mubr.f32.mxu0 %v610_v14  ;;  %922 = vmatprep.mubr.f32.mxu1 %v612_v15  ;;  %vm582_vm12 = vcmp.gt.f32.partialorder %v478_v5, 0.0  ;;  %vm584_vm13 = vcmp.gt.f32.partialorder %v567_v6, 0.0 }
 0x11f   : > { %834 = vmatmul.mubr.f32.gmra.mxu0 %v609_v7  ;;  %923 = vmatmul.mubr.f32.gmra.mxu1 %v611_v8  ;;  %v613_v20 = vsel %vm581_vm14, %v476_v1, %v597_v11  ;;  %v615_v21 = vsel %vm583_vm15, %v565_v2, %v599_v12  ;;  %v750_v23 = vrot.slane %v745_v22, %v373_v10 }
 0x120   : > { %v614_v18 = vsel %vm582_vm12, %v478_v5, %v598_v16  ;;  %v616_v19 = vsel %vm584_vm13, %v567_v6, %v600_v17  ;;  %v754_v24 = vrot.slane %v745_v22, %v377_v13 }
 0x121   : > { %839 = vmatprep.mubr.f32.mxu0 %v614_v18  ;;  %928 = vmatprep.mubr.f32.mxu1 %v616_v19 }
 0x123   : > { %840 = vmatmul.mubr.f32.gmra.mxu0 %v613_v20  ;;  %929 = vmatmul.mubr.f32.gmra.mxu1 %v615_v21 }
 0x1d7   : > { %v823_v25 = vpop.f32.mrf.mxu0  ;;  %v912_v26 = vpop.f32.mrf.mxu1 }
 0x1d8   : > { %v824_v27 = vadd.f32 %v823_v25, %v750_v23 }
 0x1d9   : > { %v825_v28 = vpop.f32.mrf.mxu0  ;;  %v914_v29 = vpop.f32.mrf.mxu1 }
 0x1da   : > { %v913_v30 = vadd.f32 %v912_v26, %v824_v27  ;;  %v826_v31 = vadd.f32 %v825_v28, %v754_v24 }
 0x1db   : > { %v829_v32 = vpop.f32.mrf.mxu0  ;;  %v918_v33 = vpop.f32.mrf.mxu1 }
 0x1dc   : > { %vm935_vm0 = vcmp.gt.f32.partialorder %v913_v30, 0.0  ;;  %v943_v10 = vmul.f32 0.01, %v913_v30  ;;  %v915_v9 = vadd.f32 %v914_v29, %v826_v31  ;;  %v830_v13 = vadd.f32 %v829_v32, %v750_v23 }
 0x1dd   : > { %v831_v34 = vpop.f32.mrf.mxu0  ;;  %v920_v35 = vpop.f32.mrf.mxu1 }
 0x1de   : > { %v951_v36 = vsel %vm935_vm0, %v913_v30, %v943_v10  ;;  %vm936_vm1 = vcmp.gt.f32.partialorder %v915_v9, 0.0  ;;  %v944_v37 = vmul.f32 0.01, %v915_v9  ;;  %v919_v38 = vadd.f32 %v918_v33, %v830_v13 }
 0x1df   : > { %959 = vst [vmem:[%s1939_s28] sm:$0xff] %v951_v36  ;;  %v832_v39 = vadd.f32 %v831_v34, %v754_v24  ;;  %v835_v40 = vpop.f32.mrf.mxu0  ;;  %v924_v41 = vpop.f32.mrf.mxu1 }
 0x1e0   : > { %v952_v42 = vsel %vm936_vm1, %v915_v9, %v944_v37  ;;  %vm937_vm2 = vcmp.gt.f32.partialorder %v919_v38, 0.0  ;;  %v945_v43 = vmul.f32 0.01, %v919_v38  ;;  %v836_v44 = vadd.f32 %v835_v40, %v750_v23 }
 0x1e1   : > { %960 = vst [vmem:[%s1939_s28 + $0x8] sm:$0xff] %v952_v42  ;;  %v921_v45 = vadd.f32 %v920_v35, %v832_v39  ;;  %v837_v46 = vpop.f32.mrf.mxu0  ;;  %v926_v47 = vpop.f32.mrf.mxu1 }
 0x1e2   : > { %v953_v48 = vsel %vm937_vm2, %v919_v38, %v945_v43  ;;  %v925_v49 = vadd.f32 %v924_v41, %v836_v44  ;;  %v838_v50 = vadd.f32 %v837_v46, %v754_v24 }
 0x1e3   : > { %961 = vst [vmem:[%s1939_s28 + $0x10] sm:$0xff] %v953_v48  ;;  %vm938_vm3 = vcmp.gt.f32.partialorder %v921_v45, 0.0  ;;  %v946_v51 = vmul.f32 0.01, %v921_v45  ;;  %v841_v52 = vpop.f32.mrf.mxu0  ;;  %v930_v56 = vpop.f32.mrf.mxu1 }
 0x1e4   : > { %vm939_vm4 = vcmp.gt.f32.partialorder %v925_v49, 0.0  ;;  %v947_v53 = vmul.f32 0.01, %v925_v49  ;;  %v927_v54 = vadd.f32 %v926_v47, %v838_v50  ;;  %v842_v55 = vadd.f32 %v841_v52, %v750_v23 }
 0x1e5   : > { %v954_v57 = vsel %vm938_vm3, %v921_v45, %v946_v51  ;;  %v843_v58 = vpop.f32.mrf.mxu0  ;;  %v932_v1 = vpop.f32.mrf.mxu1 }
 0x1e6   : > { %962 = vst [vmem:[%s1939_s28 + $0x18] sm:$0xff] %v954_v57  ;;  %v955_v59 = vsel %vm939_vm4, %v925_v49, %v947_v53  ;;  %vm940_vm5 = vcmp.gt.f32.partialorder %v927_v54, 0.0  ;;  %v948_v60 = vmul.f32 0.01, %v927_v54  ;;  %v931_v61 = vadd.f32 %v930_v56, %v842_v55 }
 0x1e7   : > { %963 = vst [vmem:[%s1939_s28 + $0x20] sm:$0xff] %v955_v59  ;;  %v844_v62 = vadd.f32 %v843_v58, %v754_v24 }
 0x1e8   : > { %v956_v63 = vsel %vm940_vm5, %v927_v54, %v948_v60  ;;  %vm941_vm6 = vcmp.gt.f32.partialorder %v931_v61, 0.0  ;;  %v949_v0 = vmul.f32 0.01, %v931_v61 }
 0x1e9   : > { %964 = vst [vmem:[%s1939_s28 + $0x28] sm:$0xff] %v956_v63  ;;  %v933_v2 = vadd.f32 %v932_v1, %v844_v62 }
 0x1ea   : > { %v957_v3 = vsel %vm941_vm6, %v931_v61, %v949_v0 }
 0x1eb   : > { %965 = vst [vmem:[%s1939_s28 + $0x30] sm:$0xff] %v957_v3  ;;  %vm942_vm7 = vcmp.gt.f32.partialorder %v933_v2, 0.0  ;;  %v950_v4 = vmul.f32 0.01, %v933_v2 }
 0x1ed   : > { %v958_v5 = vsel %vm942_vm7, %v933_v2, %v950_v4 }
 0x1ee   : > { %966 = vst [vmem:[%s1939_s28 + $0x38] sm:$0xff] %v958_v5 }
 0x1ef PF: > { %s15_s18 = sadd.s32 1, %s1054_s18  }
 0x1f0   : > { %p12_p4 = scmp.ge.s32.totalorder %s15_s18, 4  }
 0x1f2   :  { %14 = sbr.rel (!%p12_p4) target bundleno = 1 (0x1), region = 70 }

</bundles_post_ra>
